<compile_context>
chip_gen: v7x
topology: tpu7x:2x2x1
jax: 0.10.0
libtpu: 0.0.40
codegen_flags: <defaults>
</compile_context>

<pallas_src>
import functools

import jax
import jax.numpy as jnp
from jax.experimental import pallas as pl
from jax.experimental.pallas import tpu as pltpu


def _round_up(x, m):
    return (x + m - 1) // m * m


# ---------------------------------------------------------------------------
# Pallas kernel: one feature level per grid step
# ---------------------------------------------------------------------------

def _reduce_channel_kernel(x_ref, w_ref, o_ref):
    # x: (1, CinP, LANE)  bf16  packed activations; row `bias_row` holds 1.0
    # w: (1, Cout, CinP)  bf16  conv weight; column `bias_row` holds the bias
    # o: (1, Cout, LANE)  f32
    y = jnp.dot(w_ref[0], x_ref[0], preferred_element_type=jnp.float32)
    o_ref[0] = y * jnp.tanh(jax.nn.softplus(y))        # Mish, kept in f32


# ---------------------------------------------------------------------------
# One-time parameter packing (bias folded into the weight matrix)
# ---------------------------------------------------------------------------

def pack_reduce_channel_params(weights, biases, layer_dims, redu_dim):
    """weights[l]: (Cout, Cin_l, 1) f32, biases[l]: (Cout,) f32 ->
    (num_layers, Cout, CinP) bf16 slab; returns (w_packed, bias_row)."""
    n = len(weights)
    bias_row = max(layer_dims)                       # fixed "ones" row index
    cinp = _round_up(bias_row + 1, 128)              # lane-dense weight tile
    w_packed = jnp.zeros((n, redu_dim, cinp), jnp.float32)
    for l, (w, b) in enumerate(zip(weights, biases)):
        cin = layer_dims[l]
        w_packed = w_packed.at[l, :, :cin].set(w[:, :, 0])
        w_packed = w_packed.at[l, :, bias_row].set(b)
    return w_packed.astype(jnp.bfloat16), bias_row


# ---------------------------------------------------------------------------
# Forward pass (wrapper packs activations, one pallas_call, unpacks outputs)
# ---------------------------------------------------------------------------

def reduce_channel_forward(feat_list, w_packed, *, bias_row):
    n, cout, cinp = w_packed.shape
    assert len(feat_list) == n

    lane = _round_up(max(x.shape[0] * x.shape[2] for x in feat_list), 128)

    # Pack every level into a common (CinP, LANE) slab; batch folded into lanes.
    xs = []
    for x in feat_list:
        B, cin, T = x.shape
        xf = jnp.transpose(x, (1, 0, 2)).reshape(cin, B * T)     # lane = b*T + t
        xp = jnp.zeros((cinp, lane), jnp.float32)
        xp = xp.at[:cin, :B * T].set(xf)
        xp = xp.at[bias_row, :B * T].set(1.0)                    # bias "ones" row
        xs.append(xp)
    x_packed = jnp.stack(xs).astype(jnp.bfloat16)                # (n, CinP, LANE)

    out = pl.pallas_call(
        _reduce_channel_kernel,
        out_shape=jax.ShapeDtypeStruct((n, cout, lane), jnp.float32),
        grid=(n,),
        in_specs=[
            pl.BlockSpec((1, cinp, lane), lambda l: (l, 0, 0)),
            pl.BlockSpec((1, cout, cinp), lambda l: (l, 0, 0)),
        ],
        out_specs=pl.BlockSpec((1, cout, lane), lambda l: (l, 0, 0)),
        compiler_params=pltpu.CompilerParams(
            dimension_semantics=("parallel",)),
    )(x_packed, w_packed)

    # Unpack: slice valid lanes per level and restore (B, Cout, T) layout.
    results = []
    for l, x in enumerate(feat_list):
        B, _, T = x.shape
        y = out[l, :, :B * T].reshape(cout, B, T)
        results.append(jnp.transpose(y, (1, 0, 2)))
    return tuple(results)


# ---------------------------------------------------------------------------
# Pure-JAX reference (f32) for a correctness check
# ---------------------------------------------------------------------------

def reduce_channel_reference(feat_list, weights, biases):
    outs = []
    for x, w, b in zip(feat_list, weights, biases):
        y = jnp.einsum("oc,bct->bot", w[:, :, 0], x) + b[None, :, None]
        outs.append(y * jnp.tanh(jax.nn.softplus(y)))            # Mish
    return tuple(outs)


# ---------------------------------------------------------------------------

if __name__ == "__main__":
    # CAS(ME)^2 configuration from the module docstring.
    cfg = dict(
        NUM_LAYERS=4,
        LAYER_DIMS=(512, 512, 1024, 1024),
        REDU_CHA_DIM=512,
    )
    B = 2
    temporal = (16, 8, 4, 2)

    key = jax.random.PRNGKey(0)
    keys = iter(jax.random.split(key, 3 * cfg["NUM_LAYERS"]))
    weights, biases, feats = [], [], []
    for cin, t in zip(cfg["LAYER_DIMS"], temporal):
        w = (jax.random.normal(next(keys), (cfg["REDU_CHA_DIM"], cin, 1),
                               jnp.float32) / jnp.sqrt(cin))
        b = jax.random.normal(next(keys), (cfg["REDU_CHA_DIM"],),
                              jnp.float32) * 0.01
        x = jax.random.normal(next(keys), (B, cin, t), jnp.float32)
        weights.append(w)
        biases.append(b)
        feats.append(x)

    w_packed, bias_row = pack_reduce_channel_params(
        weights, biases, cfg["LAYER_DIMS"], cfg["REDU_CHA_DIM"])

    fwd = jax.jit(functools.partial(reduce_channel_forward, bias_row=bias_row))
    outs = jax.block_until_ready(fwd(tuple(feats), w_packed))

    refs = reduce_channel_reference(feats, weights, biases)

    for o, r, t in zip(outs, refs, temporal):
        assert o.shape == (B, cfg["REDU_CHA_DIM"], t), o.shape
        assert bool(jnp.all(jnp.isfinite(o)))
        # bf16 MXU operands vs f32 reference -> loose tolerance.
        assert bool(jnp.allclose(o, r, rtol=5e-2, atol=1e-1)), (
            float(jnp.max(jnp.abs(o - r))))

    print("KERNEL_OK")
</pallas_src>

<mosaic_0001>
module attributes {stable_mosaic.version = 11 : i64} {
  func.func @_reduce_channel_kernel(%arg0: i32, %arg1: memref<1x1152x128xbf16, #tpu.memory_space<vmem>>, %arg2: memref<1x512x1152xbf16, #tpu.memory_space<vmem>>, %arg3: memref<1x512x128xf32, #tpu.memory_space<vmem>>) attributes {dimension_semantics = [#tpu.dimension_semantics<parallel>], iteration_bounds = array<i64: 4>, scalar_prefetch = 0 : i64, scratch_operands = 0 : i64, tpu.core_type = #tpu.core_type<tc>, window_params = [{transform_indices = @transform_0, window_bounds = array<i64: 1, 1152, 128>}, {transform_indices = @transform_1, window_bounds = array<i64: 1, 512, 1152>}, {transform_indices = @transform_2, window_bounds = array<i64: 1, 512, 128>}]} {
    %c0 = arith.constant 0 : index
    %c0_0 = arith.constant 0 : index
    %c0_1 = arith.constant 0 : index
    %0 = vector.load %arg2[%c0, %c0_0, %c0_1] : memref<1x512x1152xbf16, #tpu.memory_space<vmem>>, vector<1x512x1152xbf16>
    %1 = vector.shape_cast %0 : vector<1x512x1152xbf16> to vector<512x1152xbf16>
    %c0_2 = arith.constant 0 : index
    %c0_3 = arith.constant 0 : index
    %c0_4 = arith.constant 0 : index
    %2 = vector.load %arg1[%c0_2, %c0_3, %c0_4] : memref<1x1152x128xbf16, #tpu.memory_space<vmem>>, vector<1x1152x128xbf16>
    %3 = vector.shape_cast %2 : vector<1x1152x128xbf16> to vector<1152x128xbf16>
    %cst = arith.constant dense<0.000000e+00> : vector<512x128xf32>
    %4 = tpu.matmul %1, %3, %cst {dimension_numbers = #tpu.dot_dimension_numbers<[1], [0], [0], [1], [0, 0, 1, 1], [], []>} : vector<512x1152xbf16>, vector<1152x128xbf16>, vector<512x128xf32> -> vector<512x128xf32>
    %cst_5 = arith.constant 0.000000e+00 : f32
    %5 = vector.broadcast %cst_5 : f32 to vector<512x128xf32>
    %6 = arith.maximumf %4, %5 : vector<512x128xf32>
    %7 = vector.broadcast %cst_5 : f32 to vector<512x128xf32>
    %8 = arith.subf %4, %7 : vector<512x128xf32>
    %9 = arith.cmpf one, %8, %8 : vector<512x128xf32>
    %10 = vector.broadcast %cst_5 : f32 to vector<512x128xf32>
    %11 = arith.addf %4, %10 : vector<512x128xf32>
    %12 = math.absf %8 : vector<512x128xf32>
    %cst_6 = arith.constant 0.000000e+00 : f32
    %13 = vector.broadcast %cst_6 : f32 to vector<512x128xf32>
    %14 = arith.subf %13, %12 : vector<512x128xf32>
    %15 = math.exp %14 : vector<512x128xf32>
    %16 = math.log1p %15 : vector<512x128xf32>
    %17 = arith.addf %6, %16 : vector<512x128xf32>
    %18 = arith.select %9, %11, %17 : vector<512x128xi1>, vector<512x128xf32>
    %19 = math.tanh %18 : vector<512x128xf32>
    %20 = arith.mulf %4, %19 : vector<512x128xf32>
    %c0_7 = arith.constant 0 : index
    %c0_8 = arith.constant 0 : index
    %c0_9 = arith.constant 0 : index
    %21 = vector.load %arg3[%c0_7, %c0_8, %c0_9] : memref<1x512x128xf32, #tpu.memory_space<vmem>>, vector<1x512x128xf32>
    %22 = vector.shape_cast %21 : vector<1x512x128xf32> to vector<512x128xf32>
    %23 = vector.shape_cast %20 : vector<512x128xf32> to vector<1x512x128xf32>
    tpu.vector_store %arg3[%c0_7, %c0_8, %c0_9], %23 {strides = array<i32>} : memref<1x512x128xf32, #tpu.memory_space<vmem>>, vector<1x512x128xf32>,
    return
  }
  func.func @transform_0(%arg0: i32) -> (i32, i32, i32) {
    %c0_i32 = arith.constant 0 : i32
    %c0_i32_0 = arith.constant 0 : i32
    %c0_i32_1 = arith.constant 0 : i32
    return %arg0, %c0_i32, %c0_i32_0 : i32, i32, i32
  }
  func.func @transform_1(%arg0: i32) -> (i32, i32, i32) {
    %c0_i32 = arith.constant 0 : i32
    %c0_i32_0 = arith.constant 0 : i32
    %c0_i32_1 = arith.constant 0 : i32
    return %arg0, %c0_i32, %c0_i32_0 : i32, i32, i32
  }
  func.func @transform_2(%arg0: i32) -> (i32, i32, i32) {
    %c0_i32 = arith.constant 0 : i32
    %c0_i32_0 = arith.constant 0 : i32
    %c0_i32_1 = arith.constant 0 : i32
    return %arg0, %c0_i32, %c0_i32_0 : i32, i32, i32
  }
}

</mosaic_0001>

<bundles_post_ra>
// kernel: squeeze.7
= control target key start
LH: loop header
LB: loop body
LE: loop exit
PB: predicated region body
PF: predicated region fallthrough
CT: control target
= control target key end

     0   :  { %2 = vsyncpa [#allocation1], 0  ;;  %s171_s0 = inlined_call_operand.vmem [shape: f32[1,512,4], index: 0, kind: input, shape index: {}]   ;;  %s172_s1 = inlined_call_operand.hbm [shape: f32[512,2,2], index: 1, kind: output, shape index: {}]  }
   0x1   :  { %v108_v0 = vld [vmem:[%s171_s0 + $0xc] sm:$0xf]  ;;  %v109_v1 = vld [vmem:[%s171_s0 + $0x8] sm:$0xf]  ;;  %v110_v2 = vld [vmem:[%s171_s0 + $0x4] sm:$0xf] }
   0x2   :  { %9 = vst [vmem:[#allocation3 + $0x18] sm:$0xf] %v108_v0  ;;  %14 = vst [vmem:[#allocation3 + $0x10] sm:$0xf] %v109_v1  ;;  %v19_v3 = vld [vmem:[%s171_s0] sm:$0xf] }
   0x3   :  { %18 = vst [vmem:[#allocation3 + $0x8] sm:$0xf] %v110_v2  ;;  %20 = vst [vmem:[#allocation3] sm:$0xf] %v19_v3  ;;  %s136_s0 = smov [#allocation0]  }
   0x4   :  { %s94_s14 = sshll.u32 %s136_s0, 4  ;;  %s95_s14 = int_to_ptr.vmem [resolvable:$true] %s94_s14 }
   0x5   :  { %s112_s15 = scalar_lea.vmem %s95_s14, 256  ;;  %p117_p1 = scmp.lt.s32.totalorder %s95_s14, %s95_s14 }
   0x6   :  { %p113_p0 = scmp.ne.s32.totalorder %s95_s14, %s112_s15  ;;  %p118_p2 = scmp.lt.s32.totalorder %s112_s15, %s112_s15 }
   0x8   :  { %p119_p3 = por %p118_p2, %p117_p1 }
   0x9   :  { %v32_v4 = vld [vmem:[#allocation3 + $0x10] sm:$0xf]   ;;  %v38_v5 = vld [vmem:[#allocation3 + $0x18] sm:$0xf]  }
   0xa   :  { %v21_v6 = vld [vmem:[#allocation3] sm:$0xf]   ;;  %v26_v7 = vld [vmem:[#allocation3 + $0x8] sm:$0xf]   ;;  %34 = vst [vmem:[#allocation2 + $0x10] sm:$0x3] %v32_v4   ;;  %p120_p4 = pnand %p119_p3, %p113_p0 }
   0xb   :  { %36 = vst [vmem:[#allocation2 + $0x2e] sm:$0xc] %v32_v4   ;;  %40 = vst [vmem:[#allocation2 + $0x18] sm:$0x3] %v38_v5  }
   0xc   :  { %42 = vst [vmem:[#allocation2 + $0x36] sm:$0xc] %v38_v5   ;;  %22 = vst [vmem:[#allocation2] sm:$0x3] %v21_v6  }
   0xd   :  { %24 = vst [vmem:[#allocation2 + $0x1e] sm:$0xc] %v21_v6   ;;  %28 = vst [vmem:[#allocation2 + $0x8] sm:$0x3] %v26_v7  }
   0xe   :  { %30 = vst [vmem:[#allocation2 + $0x26] sm:$0xc] %v26_v7  }
  0x11   :  { %v55_v8 = vld [vmem:[#allocation2 + $0x10] sm:$0x3] }
  0x12   :  { %v61_v9 = vld [vmem:[#allocation2 + $0x18] sm:$0x3]  ;;  %v79_v10 = vld [vmem:[#allocation2 + $0x30] sm:$0x3]  ;;  %59 = vst [vmem:[#allocation0 + $0x4] sm:$0x3] %v55_v8 }
  0x13   :  { %v46_v11 = vld [vmem:[#allocation2] sm:$0x3]  ;;  %65 = vst [vmem:[#allocation0 + $0x6] sm:$0x3] %v61_v9  ;;  %83 = vst [vmem:[#allocation0 + $0xc] sm:$0x3] %v79_v10 }
  0x14   :  { %v50_v12 = vld [vmem:[#allocation2 + $0x8] sm:$0x3]  ;;  %v67_v13 = vld [vmem:[#allocation2 + $0x20] sm:$0x3]  ;;  %48 = vst [vmem:[#allocation0] sm:$0x3] %v46_v11 }
  0x15   :  { %53 = vst [vmem:[#allocation0 + $0x2] sm:$0x3] %v50_v12  ;;  %71 = vst [vmem:[#allocation0 + $0x8] sm:$0x3] %v67_v13  ;;  %v73_v14 = vld [vmem:[#allocation2 + $0x28] sm:$0x3] }
  0x16   :  { %v85_v15 = vld [vmem:[#allocation2 + $0x38] sm:$0x3]  ;;  %77 = vst [vmem:[#allocation0 + $0xa] sm:$0x3] %v73_v14 }
  0x17   :  { %89 = vst [vmem:[#allocation0 + $0xe] sm:$0x3] %v85_v15 }
  0x18   :  { %123 = shalt.err (!%p120_p4)
}
  0x19   :  { %s124_s18 = scalar_lea.hbm %s172_s1, 256 }
  0x1a   :  { %p125_p5 = scmp.ne.s32.totalorder %s172_s1, %s124_s18  ;;  %p128_p6 = scmp.lt.u32.totalorder %s124_s18, %s172_s1 }
  0x1c   :  { %p130_p7 = pnand %p128_p6, %p125_p5 }
  0x1e   :  { %133 = shalt.err (!%p130_p7)
}
  0x1f   :  { %97 = dma.vmem_to_hbm [thread:$0]  %s95_s14, 256, %s172_s1, [#allocation1]  }
  0x20   :  { %134 = dma.done.wait [#allocation1], 256  }
  0x21   :  { %135 = vsyncadd [#allocation1], 4294967040 }
  0x22   :  { %99 = vsyncpa [#allocation1], 1 }

// kernel: squeeze.6
= control target key start
LH: loop header
LB: loop body
LE: loop exit
PB: predicated region body
PF: predicated region fallthrough
CT: control target
= control target key end

     0   :  { %2 = vsyncpa [#allocation1], 0  ;;  %s151_s0 = inlined_call_operand.vmem [shape: f32[1,512,8], index: 0, kind: input, shape index: {}]   ;;  %s152_s1 = inlined_call_operand.hbm [shape: f32[512,2,4], index: 1, kind: output, shape index: {}]  }
   0x1   :  { %v3_v0 = vld [vmem:[%s151_s0] sm:$0xff]   ;;  %v88_v1 = vld [vmem:[%s151_s0 + $0x8] sm:$0xff]   ;;  %v89_v2 = vld [vmem:[%s151_s0 + $0x10] sm:$0xff]  }
   0x2   :  { %4 = vst [vmem:[#allocation2] sm:$0xf] %v3_v0   ;;  %6 = vst [vmem:[#allocation2 + $0x1c] sm:$0xf0] %v3_v0   ;;  %v90_v3 = vld [vmem:[%s151_s0 + $0x18] sm:$0xff]   ;;  %s116_s0 = smov [#allocation0]  }
   0x3   :  { %10 = vst [vmem:[#allocation2 + $0x8] sm:$0xf] %v88_v1   ;;  %12 = vst [vmem:[#allocation2 + $0x24] sm:$0xf0] %v88_v1   ;;  %s76_s14 = sshll.u32 %s116_s0, 4  ;;  %s77_s14 = int_to_ptr.vmem [resolvable:$true] %s76_s14 }
   0x4   :  { %16 = vst [vmem:[#allocation2 + $0x10] sm:$0xf] %v89_v2   ;;  %18 = vst [vmem:[#allocation2 + $0x2c] sm:$0xf0] %v89_v2   ;;  %s92_s15 = scalar_lea.vmem %s77_s14, 512  ;;  %p97_p1 = scmp.lt.s32.totalorder %s77_s14, %s77_s14 }
   0x5   :  { %22 = vst [vmem:[#allocation2 + $0x18] sm:$0xf] %v90_v3   ;;  %24 = vst [vmem:[#allocation2 + $0x34] sm:$0xf0] %v90_v3   ;;  %p93_p0 = scmp.ne.s32.totalorder %s77_s14, %s92_s15  ;;  %p98_p2 = scmp.lt.s32.totalorder %s92_s15, %s92_s15 }
   0x7   :  { %p99_p3 = por %p98_p2, %p97_p1 }
   0x9   :  { %v28_v4 = vld [vmem:[#allocation2] sm:$0xf]  ;;  %p100_p4 = pnand %p99_p3, %p93_p0 }
   0xa   :  { %v32_v5 = vld [vmem:[#allocation2 + $0x8] sm:$0xf]  ;;  %v49_v6 = vld [vmem:[#allocation2 + $0x20] sm:$0xf]  ;;  %30 = vst [vmem:[#allocation0] sm:$0xf] %v28_v4 }
   0xb   :  { %35 = vst [vmem:[#allocation0 + $0x4] sm:$0xf] %v32_v5  ;;  %v37_v7 = vld [vmem:[#allocation2 + $0x10] sm:$0xf]  ;;  %53 = vst [vmem:[#allocation0 + $0x10] sm:$0xf] %v49_v6 }
   0xc   :  { %v43_v8 = vld [vmem:[#allocation2 + $0x18] sm:$0xf]  ;;  %v55_v9 = vld [vmem:[#allocation2 + $0x28] sm:$0xf]  ;;  %41 = vst [vmem:[#allocation0 + $0x8] sm:$0xf] %v37_v7 }
   0xd   :  { %47 = vst [vmem:[#allocation0 + $0xc] sm:$0xf] %v43_v8  ;;  %59 = vst [vmem:[#allocation0 + $0x14] sm:$0xf] %v55_v9  ;;  %v61_v10 = vld [vmem:[#allocation2 + $0x30] sm:$0xf] }
   0xe   :  { %v67_v11 = vld [vmem:[#allocation2 + $0x38] sm:$0xf]  ;;  %65 = vst [vmem:[#allocation0 + $0x18] sm:$0xf] %v61_v10 }
   0xf   :  { %71 = vst [vmem:[#allocation0 + $0x1c] sm:$0xf] %v67_v11 }
  0x10   :  { %103 = shalt.err (!%p100_p4)
}
  0x11   :  { %s104_s18 = scalar_lea.hbm %s152_s1, 512 }
  0x12   :  { %p105_p5 = scmp.ne.s32.totalorder %s152_s1, %s104_s18  ;;  %p108_p6 = scmp.lt.u32.totalorder %s104_s18, %s152_s1 }
  0x14   :  { %p110_p7 = pnand %p108_p6, %p105_p5 }
  0x16   :  { %113 = shalt.err (!%p110_p7)
}
  0x17   :  { %79 = dma.vmem_to_hbm [thread:$0]  %s77_s14, 512, %s152_s1, [#allocation1]  }
  0x18   :  { %114 = dma.done.wait [#allocation1], 512  }
  0x19   :  { %115 = vsyncadd [#allocation1], 4294966784 }
  0x1a   :  { %81 = vsyncpa [#allocation1], 1 }

</bundles_post_ra>
